<compile_context>
chip_gen: v7x
topology: tpu7x:2x2x1
jax: 0.10.0
libtpu: 0.0.40
codegen_flags: <defaults>
</compile_context>

<pallas_src>
import jax
import jax.numpy as jnp
from jax.experimental import pallas as pl
from jax.experimental.pallas import tpu as pltpu

IN_FEATURES = 28 * 28        # 784
OUT_FEATURES = 10
N_PAD = 128                  # lane-dense padded output width
DEFAULT_TM = 2048            # row tile cap (bf16 X tile: 2048*784*2 ~ 3.1 MiB)
MIN_GRID_STEPS = 4           # aim for >=4 row tiles: pipelining + 2-TC sharding
VMEM_LIMIT_BYTES = 32 * 1024 * 1024  # raise v5e's 16 MiB default; fine on v6e/v7x


def _round_up(v, m):
    return ((v + m - 1) // m) * m


def linear_kernel(x_ref, w_ref, b_ref, o_ref):
    # (TM, 784) bf16 @ (784, 128) bf16 on the MXU with f32 accumulation,
    # then broadcast-add the f32 (1, 128) bias row.  Lane-dense f32 store.
    acc = jnp.dot(x_ref[...], w_ref[...], preferred_element_type=jnp.float32)
    o_ref[...] = (acc + b_ref[...]).astype(o_ref.dtype)


def linear_pallas(x_flat, w_pad, b_pad, *, tm_max=DEFAULT_TM):
    """x_flat: (B, 784) f32, w_pad: (784, 128) bf16, b_pad: (1, 128) f32.

    Returns (B, 128) f32; caller slices to the true output width.
    """
    B, K = x_flat.shape
    NP = w_pad.shape[1]

    # Stream the activations as bf16 (f32 accumulation happens in-kernel).
    x_bf16 = x_flat.astype(jnp.bfloat16)

    # Pad only to the 8-row sublane boundary (<= 7 rows); no TM round-up.
    b8 = max(8, _round_up(B, 8))
    if b8 != B:
        x_bf16 = jnp.pad(x_bf16, ((0, b8 - B), (0, 0)))

    # Row tile: big enough to amortize the ~0.35us/step overhead, small enough
    # to give >= MIN_GRID_STEPS tiles for double-buffering / 2-TC sharding.
    tm = min(tm_max, max(8, _round_up(pl.cdiv(b8, MIN_GRID_STEPS), 8)))
    grid = (pl.cdiv(b8, tm),)   # ragged last tile handled (masked) by Pallas

    cost = pl.CostEstimate(
        flops=2 * b8 * K * NP,
        transcendentals=0,
        bytes_accessed=(b8 * K * 2          # stream X (bf16)
                        + K * NP * 2        # weight (bf16, read once)
                        + NP * 4            # bias (f32)
                        + b8 * NP * 4),     # output (f32, lane-dense)
    )

    out = pl.pallas_call(
        linear_kernel,
        out_shape=jax.ShapeDtypeStruct((b8, NP), jnp.float32),
        grid_spec=pltpu.PrefetchScalarGridSpec(
            num_scalar_prefetch=0,
            grid=grid,
            in_specs=[
                # X: tiled along rows -> double-buffered / pipelined.
                pl.BlockSpec((tm, K), lambda i: (i, 0)),
                # W, b: constant block index -> fetched once, VMEM-resident.
                pl.BlockSpec((K, NP), lambda i: (0, 0)),
                pl.BlockSpec((1, NP), lambda i: (0, 0)),
            ],
            out_specs=pl.BlockSpec((tm, NP), lambda i: (i, 0)),
        ),
        compiler_params=pltpu.CompilerParams(
            # Independent row tiles -> shard across both TCs on v7x.
            dimension_semantics=("parallel",),
            vmem_limit_bytes=VMEM_LIMIT_BYTES,
        ),
        cost_estimate=cost,
    )(x_bf16, w_pad, b_pad)

    return out[:B]


def model_forward(x, w_pad, b_pad):
    # x: (B, 1, 28, 28)  ->  view(-1, 784)  ->  Linear(784, 10)
    x_flat = x.reshape(-1, IN_FEATURES)
    out_padded = linear_pallas(x_flat, w_pad, b_pad)
    return out_padded[:, :OUT_FEATURES]


def init_params(key):
    """nn.Linear-style uniform init; returns lane-padded bf16 W / f32 bias."""
    k_w, k_b = jax.random.split(key, 2)
    bound = 1.0 / jnp.sqrt(jnp.float32(IN_FEATURES))
    # Stored as (in, out) = transpose of PyTorch's (out, in) weight.
    w = jax.random.uniform(
        k_w, (IN_FEATURES, OUT_FEATURES), jnp.float32, -bound, bound)
    b = jax.random.uniform(
        k_b, (1, OUT_FEATURES), jnp.float32, -bound, bound)
    # Pad once at init time to a lane-dense 128-wide layout; weight as bf16.
    w_pad = jnp.pad(w, ((0, 0), (0, N_PAD - OUT_FEATURES))).astype(jnp.bfloat16)
    b_pad = jnp.pad(b, ((0, 0), (0, N_PAD - OUT_FEATURES)))
    return w, b, w_pad, b_pad


if __name__ == "__main__":
    key = jax.random.PRNGKey(0)
    k_x, k_p = jax.random.split(key, 2)

    B = 2
    w, b, w_pad, b_pad = init_params(k_p)

    # Example input: NCHW (B, 1, 28, 28) like MNIST.
    x = jax.random.normal(k_x, (B, 1, 28, 28), jnp.float32)

    fwd = jax.jit(model_forward)
    out = fwd(x, w_pad, b_pad)
    out = jax.block_until_ready(out)

    x_flat = x.reshape(-1, IN_FEATURES)

    # Tight check against a reference using the same bf16 input rounding
    # (kernel accumulates in f32, so this should agree to f32 rounding).
    ref_bf16 = (x_flat.astype(jnp.bfloat16).astype(jnp.float32)
                @ w.astype(jnp.bfloat16).astype(jnp.float32)) + b
    # Loose sanity check against the full-f32 PyTorch-equivalent math.
    ref_f32 = x_flat @ w + b

    assert out.shape == (B, OUT_FEATURES)
    assert jnp.allclose(out, ref_bf16, atol=1e-4, rtol=1e-4)
    assert jnp.allclose(out, ref_f32, atol=2e-2, rtol=2e-2)

    print("KERNEL_OK")
</pallas_src>

<mosaic_0001>
module attributes {stable_mosaic.version = 11 : i64} {
  func.func @linear_kernel(%arg0: i32, %arg1: memref<8x784xbf16, #tpu.memory_space<vmem>>, %arg2: memref<784x128xbf16, #tpu.memory_space<vmem>>, %arg3: memref<1x128xf32, #tpu.memory_space<vmem>>, %arg4: memref<8x128xf32, #tpu.memory_space<vmem>>) attributes {dimension_semantics = [#tpu.dimension_semantics<parallel>], iteration_bounds = array<i64: 1>, scalar_prefetch = 0 : i64, scratch_operands = 0 : i64, tpu.core_type = #tpu.core_type<tc>, window_params = [{transform_indices = @transform_0, window_bounds = array<i64: 8, 784>}, {pipeline_mode = #tpu.pipeline_mode<synchronous>, transform_indices = @transform_1, window_bounds = array<i64: 784, 128>}, {pipeline_mode = #tpu.pipeline_mode<synchronous>, transform_indices = @transform_2, window_bounds = array<i64: 1, 128>}, {transform_indices = @transform_3, window_bounds = array<i64: 8, 128>}]} {
    %c0 = arith.constant 0 : index
    %c0_0 = arith.constant 0 : index
    %0 = vector.load %arg1[%c0, %c0_0] : memref<8x784xbf16, #tpu.memory_space<vmem>>, vector<8x784xbf16>
    %c0_1 = arith.constant 0 : index
    %c0_2 = arith.constant 0 : index
    %1 = vector.load %arg2[%c0_1, %c0_2] : memref<784x128xbf16, #tpu.memory_space<vmem>>, vector<784x128xbf16>
    %cst = arith.constant dense<0.000000e+00> : vector<8x128xf32>
    %2 = tpu.matmul %0, %1, %cst {dimension_numbers = #tpu.dot_dimension_numbers<[1], [0], [0], [1], [0, 0, 1, 1], [], []>} : vector<8x784xbf16>, vector<784x128xbf16>, vector<8x128xf32> -> vector<8x128xf32>
    %c0_3 = arith.constant 0 : index
    %c0_4 = arith.constant 0 : index
    %3 = vector.load %arg3[%c0_3, %c0_4] : memref<1x128xf32, #tpu.memory_space<vmem>>, vector<1x128xf32>
    %4 = vector.broadcast %3 : vector<1x128xf32> to vector<8x128xf32>
    %5 = arith.addf %2, %4 : vector<8x128xf32>
    %c0_5 = arith.constant 0 : index
    %c0_6 = arith.constant 0 : index
    %6 = vector.load %arg4[%c0_5, %c0_6] : memref<8x128xf32, #tpu.memory_space<vmem>>, vector<8x128xf32>
    tpu.vector_store %arg4[%c0_5, %c0_6], %5 {strides = array<i32>} : memref<8x128xf32, #tpu.memory_space<vmem>>, vector<8x128xf32>,
    return
  }
  func.func @transform_0(%arg0: i32) -> (i32, i32) {
    %c0_i32 = arith.constant 0 : i32
    %c0_i32_0 = arith.constant 0 : i32
    return %arg0, %c0_i32 : i32, i32
  }
  func.func @transform_1(%arg0: i32) -> (i32, i32) {
    %c0_i32 = arith.constant 0 : i32
    %c0_i32_0 = arith.constant 0 : i32
    %c0_i32_1 = arith.constant 0 : i32
    return %c0_i32, %c0_i32_0 : i32, i32
  }
  func.func @transform_2(%arg0: i32) -> (i32, i32) {
    %c0_i32 = arith.constant 0 : i32
    %c0_i32_0 = arith.constant 0 : i32
    %c0_i32_1 = arith.constant 0 : i32
    return %c0_i32, %c0_i32_0 : i32, i32
  }
  func.func @transform_3(%arg0: i32) -> (i32, i32) {
    %c0_i32 = arith.constant 0 : i32
    %c0_i32_0 = arith.constant 0 : i32
    return %arg0, %c0_i32 : i32, i32
  }
}

</mosaic_0001>

<bundles_post_ra>
// kernel: model_forward.1
= control target key start
LH: loop header
LB: loop body
LE: loop exit
PB: predicated region body
PF: predicated region fallthrough
CT: control target
= control target key end

     0   :  { %8 = vsyncpa [#allocation3], 0  ;;  %s843_s12 = smov [#allocation2]   ;;  %s898_s0 = inlined_call_operand.vmem [shape: bf16[8,784], index: 0, kind: input, shape index: {}]   ;;  %s899_s1 = inlined_call_operand.hbm [shape: bf16[784,128], index: 1, kind: input, shape index: {}]   ;;  %s900_s2 = inlined_call_operand.vmem [shape: f32[1,128], index: 2, kind: input, shape index: {}]   ;;  %s901_s3 = inlined_call_operand.vmem [shape: f32[8,128], index: 3, kind: output, shape index: {}]  }
   0x1   :  { %s16_s13 = sshll.u32 %s843_s12, 4  ;;  %s819_s16 = scalar_lea.hbm %s899_s1, 6272  ;;  %s17_s13 = int_to_ptr.vmem [resolvable:$true] %s16_s13 }
   0x2   :  { %p820_p0 = scmp.ne.s32.totalorder %s899_s1, %s819_s16  ;;  %p823_p1 = scmp.lt.u32.totalorder %s819_s16, %s899_s1 }
   0x4   :  { %p825_p2 = pnand %p823_p1, %p820_p0 }
   0x6   :  { %828 = shalt.err (!%p825_p2)
}
   0x7   :  { %s829_s21 = scalar_lea.vmem %s17_s13, 6272  ;;  %p834_p4 = scmp.lt.s32.totalorder %s17_s13, %s17_s13 }
   0x8   :  { %p830_p3 = scmp.ne.s32.totalorder %s17_s13, %s829_s21  ;;  %p835_p5 = scmp.lt.s32.totalorder %s829_s21, %s829_s21 }
   0xa   :  { %p836_p6 = por %p835_p5, %p834_p4 }
   0xc   :  { %p837_p7 = pnand %p836_p6, %p830_p3 }
   0xe   :  { %840 = shalt.err (!%p837_p7)
}
   0xf   :  { %s844_s22 = smov 64   ;;  %s845_s23 = smov 4  }
  0x10   :  { %22 = dma.hbm_to_vmem [thread:$0]  %s899_s1, 6272, %s17_s13, [#allocation3], %s844_s22, %s844_s22, %s845_s23  }
  0x11   :  { %841 = dma.done.wait [#allocation3], 6272  }
  0x12   :  { %842 = vsyncadd [#allocation3], 4294961024  ;;  %v763_v0 = vld [vmem:[#allocation2 + $0x40] sm:$0xff]   ;;  %v767_v4 = vld [vmem:[#allocation2 + $0x48] sm:$0xff]   ;;  %v846_v43 = vmov 0.0   ;;  %vm847_vm0 = vmmov 0  }
  0x13   :  { %v764_v1 = vld [vmem:[#allocation2] sm:$0xff]   ;;  %684 = vmatprep.subr.bf16.mxu0 %v763_v0  ;;  %v768_v5 = vld [vmem:[#allocation2 + $0x8] sm:$0xff]   ;;  %v771_v8 = vld [vmem:[#allocation2 + $0x50] sm:$0xff]   ;;  %vm456_vm1 = vcmask 130048  }
  0x14   :  { %v765_v2 = vld [vmem:[#allocation2 + $0xc0] sm:$0xff]   ;;  %685 = vmatpush3.bf16.msra.mxu0 %v764_v1  ;;  %v769_v6 = vld [vmem:[#allocation2 + $0xc8] sm:$0xff]   ;;  %v772_v9 = vld [vmem:[#allocation2 + $0x10] sm:$0xff]  }
  0x15   :  { %v766_v3 = vld [vmem:[#allocation2 + $0x80] sm:$0xff]   ;;  %706 = vmatprep.subr.bf16.mxu1 %v765_v2  ;;  %686 = vmatprep.subr.bf16.mxu0 %v767_v4  ;;  %v770_v7 = vld [vmem:[#allocation2 + $0x88] sm:$0xff]   ;;  %v773_v10 = vld [vmem:[#allocation2 + $0xd0] sm:$0xff]  }
  0x16   :  { %707 = vmatpush3.bf16.msra.mxu1 %v766_v3  ;;  %v774_v11 = vld [vmem:[#allocation2 + $0x90] sm:$0xff]   ;;  %v775_v12 = vld [vmem:[#allocation2 + $0x58] sm:$0xff]   ;;  %v779_v16 = vld [vmem:[#allocation2 + $0x60] sm:$0xff]  }
  0x17   :  { %708 = vmatprep.subr.bf16.mxu1 %v769_v6  ;;  %v776_v13 = vld [vmem:[#allocation2 + $0x18] sm:$0xff]   ;;  %v780_v17 = vld [vmem:[#allocation2 + $0x20] sm:$0xff]   ;;  %v783_v20 = vld [vmem:[#allocation2 + $0x68] sm:$0xff]  }
  0x18   :  { %687 = vmatpush3.bf16.msra.mxu0 %v768_v5  ;;  %v777_v14 = vld [vmem:[#allocation2 + $0xd8] sm:$0xff]   ;;  %v781_v18 = vld [vmem:[#allocation2 + $0xe0] sm:$0xff]   ;;  %v784_v21 = vld [vmem:[#allocation2 + $0x28] sm:$0xff]  }
  0x19   :  { %688 = vmatprep.subr.bf16.mxu0 %v771_v8  ;;  %v778_v15 = vld [vmem:[#allocation2 + $0x98] sm:$0xff]   ;;  %v782_v19 = vld [vmem:[#allocation2 + $0xa0] sm:$0xff]   ;;  %v785_v22 = vld [vmem:[#allocation2 + $0xe8] sm:$0xff]  }
  0x1a   :  { %709 = vmatpush3.bf16.msra.mxu1 %v770_v7  ;;  %v786_v23 = vld [vmem:[#allocation2 + $0xa8] sm:$0xff]   ;;  %v787_v24 = vld [vmem:[#allocation2 + $0x70] sm:$0xff]   ;;  %v791_v28 = vld [vmem:[#allocation2 + $0x78] sm:$0xff]  }
  0x1b   :  { %710 = vmatprep.subr.bf16.mxu1 %v773_v10  ;;  %v788_v25 = vld [vmem:[#allocation2 + $0x30] sm:$0xff]   ;;  %v792_v29 = vld [vmem:[#allocation2 + $0x38] sm:$0xff]   ;;  %v29_v31 = vld [vmem:[%s898_s0] sm:$0xff] }
  0x1c   :  { %689 = vmatpush3.bf16.msra.mxu0 %v772_v9  ;;  %v789_v26 = vld [vmem:[#allocation2 + $0xf0] sm:$0xff]   ;;  %v793_v30 = vld [vmem:[#allocation2 + $0xf8] sm:$0xff]   ;;  %v627_v32 = vcombine.low %v29_v31, %v29_v31  ;;  %v628_v33 = vcombine.high %v29_v31, %v29_v31  ;;  %v797_v35 = vld [vmem:[#allocation2 + $0x140] sm:$0xff]  }
  0x1d   :  { %690 = vmatprep.subr.bf16.mxu0 %v775_v12  ;;  %v790_v27 = vld [vmem:[#allocation2 + $0xb0] sm:$0xff]   ;;  %v796_v34 = vld [vmem:[#allocation2 + $0xb8] sm:$0xff]   ;;  %v30_v36 = vld [vmem:[%s898_s0 + $0x8] sm:$0xff] }
  0x1e   :  { %711 = vmatpush3.bf16.msra.mxu1 %v774_v11  ;;  %492 = vmatprep.mubr.bf16.mxu0 %v628_v33  ;;  %v629_v37 = vcombine.low %v30_v36, %v30_v36  ;;  %v630_v38 = vcombine.high %v30_v36, %v30_v36  ;;  %v800_v39 = vld [vmem:[#allocation2 + $0x100] sm:$0xff]   ;;  %v801_v40 = vld [vmem:[#allocation2 + $0x148] sm:$0xff]   ;;  %v803_v42 = vld [vmem:[#allocation2 + $0x150] sm:$0xff]  }
  0x1f   :  { %712 = vmatprep.subr.bf16.mxu1 %v777_v14  ;;  %v802_v41 = vld [vmem:[#allocation2 + $0x108] sm:$0xff]   ;;  %v804_v44 = vld [vmem:[#allocation2 + $0x110] sm:$0xff]   ;;  %v805_v45 = vld [vmem:[#allocation2 + $0x158] sm:$0xff]  }
  0x20   :  { %691 = vmatpush3.bf16.msra.mxu0 %v776_v13  ;;  %532 = vmatprep.mubr.bf16.mxu1 %v630_v38  ;;  %v806_v46 = vld [vmem:[#allocation2 + $0x118] sm:$0xff]   ;;  %v807_v47 = vld [vmem:[#allocation2 + $0x160] sm:$0xff]   ;;  %v809_v49 = vld [vmem:[#allocation2 + $0x168] sm:$0xff]  }
  0x21   :  { %692 = vmatprep.subr.bf16.mxu0 %v779_v16  ;;  %v808_v48 = vld [vmem:[#allocation2 + $0x120] sm:$0xff]   ;;  %v31_v51 = vld [vmem:[%s898_s0 + $0x10] sm:$0xff]  ;;  %v818_v53 = vld [vmem:[%s898_s0 + $0x18] ss:$0 sps:$4 sm:$0xff]  }
  0x22   :  { %713 = vmatpush3.bf16.msra.mxu1 %v778_v15  ;;  %v815_v50 = vld [vmem:[#allocation2 + $0x180] sm:$0xff]   ;;  %v632_v52 = vcombine.high %v31_v51, %v31_v51  ;;  %v810_v54 = vld [vmem:[#allocation2 + $0x128] sm:$0xff]   ;;  %v811_v55 = vld [vmem:[#allocation2 + $0x170] sm:$0xff]   ;;  %v631_v59 = vcombine.low %v31_v51, %v31_v51 }
  0x23   :  { %714 = vmatprep.subr.bf16.mxu1 %v781_v18  ;;  %v812_v56 = vld [vmem:[#allocation2 + $0x130] sm:$0xff]   ;;  %v813_v57 = vld [vmem:[#allocation2 + $0x178] sm:$0xff]   ;;  %v626_v61 = vld [vmem:[%s900_s2] ss:$0 sm:$0xff] }
  0x24   :  { %693 = vmatpush3.bf16.msra.mxu0 %v780_v17  ;;  %v814_v58 = vld [vmem:[#allocation2 + $0x138] sm:$0xff]  }
  0x25   :  { %694 = vmatprep.subr.bf16.mxu0 %v783_v20 }
  0x26   :  { %715 = vmatpush3.bf16.msra.mxu1 %v782_v19 }
  0x27   :  { %716 = vmatprep.subr.bf16.mxu1 %v785_v22 }
  0x28   :  { %695 = vmatpush3.bf16.msra.mxu0 %v784_v21 }
  0x29   :  { %696 = vmatprep.subr.bf16.mxu0 %v787_v24 }
  0x2a   :  { %717 = vmatpush3.bf16.msra.mxu1 %v786_v23 }
  0x2b   :  { %718 = vmatprep.subr.bf16.mxu1 %v789_v26 }
  0x2c   :  { %697 = vmatpush3.bf16.msra.mxu0 %v788_v25 }
  0x2d   :  { %698 = vmatprep.subr.bf16.mxu0 %v791_v28 }
  0x2e   :  { %719 = vmatpush3.bf16.msra.mxu1 %v790_v27 }
  0x2f   :  { %720 = vmatprep.subr.bf16.mxu1 %v793_v30 }
  0x30   :  { %699 = vmatpush3.bf16.msra.mxu0 %v792_v29 }
  0x31   :  { %728 = vmatprep.subr.bf16.mxu0 %v797_v35 }
  0x32   :  { %721 = vmatpush3.bf16.msra.mxu1 %v796_v34 }
  0x33   :  { %493 = vmatmul.mubr.bf16.vlgmr.msra.gmra.mrb[0].mxu0 %v627_v32  ;;  %752 = vmatprep.subr.bf16.mxu1 %v846_v43 }
  0x34   :  { %729 = vmatpush3.bf16.msra.mxu0 %v800_v39  ;;  %572 = vmatprep.mubr.bf16.mxu0 %v632_v52 }
  0x35   :  { %533 = vmatmul.mubr.bf16.vlgmr.msra.gmra.mrb[0].mxu1 %v629_v37  ;;  %730 = vmatprep.subr.bf16.mxu0 %v801_v40 }
  0x36   :  { %754 = vmatprep.mubr.msk.bf16.mxu1 %vm847_vm0, %v846_v43  ;;  %753 = vmatpush3.bf16.msra.mxu1 %v815_v50 }
  0x38   :  { %731 = vmatpush3.bf16.msra.mxu0 %v802_v41 }
  0x39   :  { %732 = vmatprep.subr.bf16.mxu0 %v803_v42 }
  0x3c   :  { %733 = vmatpush3.bf16.msra.mxu0 %v804_v44 }
  0x3d   :  { %734 = vmatprep.subr.bf16.mxu0 %v805_v45  ;;  %755 = vmatmul.mubr.msk.bf16.vlgmr.msra.gmra.mrb[4].mxu1 %vm456_vm1, %v818_v53 }
  0x40   :  { %735 = vmatpush3.bf16.msra.mxu0 %v806_v46 }
  0x41   :  { %736 = vmatprep.subr.bf16.mxu0 %v807_v47 }
  0x44   :  { %737 = vmatpush3.bf16.msra.mxu0 %v808_v48 }
  0x45   :  { %738 = vmatprep.subr.bf16.mxu0 %v809_v49 }
  0x48   :  { %739 = vmatpush3.bf16.msra.mxu0 %v810_v54 }
  0x49   :  { %740 = vmatprep.subr.bf16.mxu0 %v811_v55 }
  0x4c   :  { %741 = vmatpush3.bf16.msra.mxu0 %v812_v56 }
  0x4d   :  { %742 = vmatprep.subr.bf16.mxu0 %v813_v57 }
  0x50   :  { %743 = vmatpush3.bf16.msra.mxu0 %v814_v58 }
  0x53   :  { %573 = vmatmul.mubr.bf16.vlgmr.msra.gmra.mrb[4].mxu0 %v631_v59 }
 0x106   :  { %v700_v60 = vpop.f32.mrb[0].mxu0 }
 0x107   :  { %v701_v62 = vpop.f32.mrb[1].mxu0 }
 0x108   :  { %v702_v63 = vadd.f32 %v701_v62, %v700_v60  ;;  %v703_v0 = vpop.f32.mrb[2].mxu0  ;;  %v722_v1 = vpop.f32.mrb[0].mxu1 }
 0x109   :  { %v704_v2 = vpop.f32.mrb[3].mxu0  ;;  %v723_v3 = vpop.f32.mrb[1].mxu1 }
 0x10a   :  { %v495_v4 = vadd.f32 %v702_v63, %v626_v61  ;;  %v724_v5 = vadd.f32 %v723_v3, %v722_v1  ;;  %v725_v6 = vpop.f32.mrb[2].mxu1 }
 0x10b   :  { %v726_v7 = vpop.f32.mrb[3].mxu1 }
 0x10c   :  { %v535_v8 = vadd.f32 %v724_v5, %v495_v4 }
 0x110   :  { %v614_v9 = vpop.f32.mrb[4].mxu1 }
 0x111   :  { %v756_v10 = vpop.f32.mrb[5].mxu1 }
 0x112   :  { %v617_v11 = vpop.f32.mrb[6].mxu1 }
 0x113   :  { %v757_v12 = vpop.f32.mrb[7].mxu1 }
 0x126   :  { %v744_v13 = vpop.f32.mrb[4].mxu0 }
 0x127   :  { %v745_v14 = vpop.f32.mrb[5].mxu0 }
 0x128   :  { %v746_v15 = vadd.f32 %v745_v14, %v744_v13  ;;  %v747_v16 = vpop.f32.mrb[6].mxu0 }
 0x129   :  { %v748_v17 = vpop.f32.mrb[7].mxu0 }
 0x12a   :  { %v575_v18 = vadd.f32 %v746_v15, %v535_v8 }
 0x12c   :  { %v615_v19 = vadd.f32 %v614_v9, %v575_v18 }
 0x12e   :  { %620 = vst [vmem:[%s901_s3] sm:$0xff] %v615_v19 }
 0x12f   :  { %625 = vsyncpa [#allocation3], 1 }

</bundles_post_ra>
